<compile_context>
chip_gen: v5e
topology: v5e:2x2
jax: 0.10.0
libtpu: 0.0.40
codegen_flags: <defaults>
</compile_context>

<pallas_src>
import jax
import jax.numpy as jnp
from jax import lax
from jax.experimental import pallas as pl
from jax.experimental.pallas import tpu as pltpu


def _round_up(v, mult):
    return ((v + mult - 1) // mult) * mult


def _tensorcores_per_chip():
    # v7x packs 2 TensorCores per chip; v5e/v6e have 1.  Query defensively so a
    # missing attribute / non-TPU interpreter never breaks the wrapper.
    try:
        info = pltpu.get_tpu_info()
    except Exception:
        return 1
    for attr in ("num_tensorcores", "tensorcores_per_chip", "num_cores"):
        val = getattr(info, attr, None)
        if isinstance(val, int) and val > 0:
            return val
    return 1


def _rec_gram_kernel(x_ref, p_ref, o_ref):
    # x: (tile_n, m) streamed row tile; p: (m, m_pad) f32, resident (constant map).
    # Upcast the streamed operand at the matmul boundary; keep P in f32 so the
    # Gram matrix is never downcast (review correctness concern).
    x = x_ref[...].astype(jnp.float32)
    out = jnp.dot(x, p_ref[...], preferred_element_type=jnp.float32)   # (tile_n, m_pad)
    o_ref[...] = out.astype(o_ref.dtype)


def _rec_twopass_kernel(x_ref, v_ref, vpad_ref, o_ref):
    # Original (x @ V) @ V^T association for large m (Gram form would be more
    # flops and need a huge resident P).  The second matmul contracts the k axis
    # of both operands, so no explicit transpose / XLU relayout of V is needed.
    x = x_ref[...].astype(jnp.float32)
    xv = jnp.dot(x, v_ref[...], preferred_element_type=jnp.float32)    # (tile_n, k)
    out = lax.dot_general(
        xv, vpad_ref[...],
        dimension_numbers=(((1,), (1,)), ((), ())),
        preferred_element_type=jnp.float32,
    )                                                                  # (tile_n, m_pad)
    o_ref[...] = out.astype(o_ref.dtype)


def rec_layer(x, V, *, target_tile_bytes=2 << 20, use_gram=None, out_dtype=None):
    """out = (x @ V) @ V.T (RecLayer.forward). x: (n, m); V: (m, k)."""
    n, m = x.shape
    mv, k = V.shape
    assert m == mv, "x feature dim must match V rows"
    out_dtype = x.dtype if out_dtype is None else jnp.dtype(out_dtype)

    m_pad = _round_up(m, 128)                       # lane-dense output width
    v_f32 = V.astype(jnp.float32)
    v_pad = jnp.pad(v_f32, ((0, m_pad - m), (0, 0)))   # (m_pad, k); pad rows zero

    # Re-association guard: Gram form only while 2*n*m*m_pad flops stay in the
    # same ballpark as the two-pass ~4*n*m*k and P fits comfortably in VMEM.
    if use_gram is None:
        use_gram = (pl.cdiv(m, 128) <= 2 * pl.cdiv(k, 128)
                    and m_pad * m_pad * 4 <= (8 << 20))

    x_bytes = jnp.dtype(x.dtype).itemsize
    o_bytes = out_dtype.itemsize

    # tile_n sized by bytes per grid step (streamed x tile + out tile).
    row_bytes = m * x_bytes + m_pad * o_bytes
    tile_n = max(target_tile_bytes // row_bytes, 256)
    tile_n = _round_up(tile_n, 128)
    if tile_n >= n:
        tile_n = n            # single full-extent block (exempt from (8,128) rule)
    # v7x: keep both TensorCores fed when n is large enough that splitting is free.
    num_tc = _tensorcores_per_chip()
    if num_tc > 1 and pl.cdiv(n, tile_n) < num_tc and n >= num_tc * 128:
        tile_n = _round_up(pl.cdiv(n, num_tc), 128)

    grid = (pl.cdiv(n, tile_n),)

    x_spec = pl.BlockSpec((tile_n, m), lambda i: (i, 0))
    out_spec = pl.BlockSpec((tile_n, m_pad), lambda i: (i, 0))

    if use_gram:
        # P = V @ V_pad^T computed once here (wrapper / XLA); zero pad columns
        # guarantee the padded output columns are exactly zero.
        p = lax.dot_general(v_f32, v_pad,
                            dimension_numbers=(((1,), (1,)), ((), ())),
                            preferred_element_type=jnp.float32)        # (m, m_pad)
        kernel = _rec_gram_kernel
        operands = (x, p)
        in_specs = [x_spec, pl.BlockSpec((m, m_pad), lambda i: (0, 0))]
        flops = 2 * n * m * m_pad
        const_bytes = m * m_pad * 4
    else:
        kernel = _rec_twopass_kernel
        operands = (x, v_f32, v_pad)
        in_specs = [x_spec,
                    pl.BlockSpec((m, k), lambda i: (0, 0)),
                    pl.BlockSpec((m_pad, k), lambda i: (0, 0))]
        flops = 2 * n * m * k + 2 * n * k * m_pad
        const_bytes = (m + m_pad) * k * 4
        # TODO(synk): for very large m the resident V itself outgrows VMEM; that
        # regime needs a second grid axis tiling V over its rows.

    cost = pl.CostEstimate(
        flops=int(flops),
        transcendentals=0,
        bytes_accessed=int(n * m * x_bytes + n * m_pad * o_bytes + const_bytes),
    )

    # VMEM budget: 2 double-buffered x tiles + 2 out tiles (lane-padded to 128
    # in VMEM) + resident constants, with headroom; capped at 64 MiB so the same
    # config compiles on v7x (64 MiB physical) as well as v5e/v6e (128 MiB).
    need = 2 * tile_n * m_pad * (x_bytes + o_bytes) + 2 * const_bytes
    vmem_limit = int(min(max(need * 3 // 2, 32 << 20), 64 << 20))

    out_padded = pl.pallas_call(
        kernel,
        out_shape=jax.ShapeDtypeStruct((n, m_pad), out_dtype),
        grid_spec=pltpu.PrefetchScalarGridSpec(
            num_scalar_prefetch=0,
            grid=grid,
            in_specs=in_specs,
            out_specs=out_spec,
        ),
        compiler_params=pltpu.CompilerParams(
            dimension_semantics=("parallel",),      # row tiles are independent
            vmem_limit_bytes=vmem_limit,
        ),
        cost_estimate=cost,
    )(*operands)

    return out_padded[:, :m] if m_pad != m else out_padded


def make_orthogonal(key, rows, cols):
    # Deterministic stand-in for torch.nn.init.orthogonal_ (gain=1):
    # QR of a random Gaussian matrix, sign-fixed for determinism.
    a = jax.random.normal(key, (rows, cols), dtype=jnp.float32)
    q, r = jnp.linalg.qr(a)
    d = jnp.sign(jnp.diagonal(r))
    d = jnp.where(d == 0, 1.0, d)
    return q * d[None, :]


if __name__ == "__main__":
    key = jax.random.PRNGKey(0)
    kx, kv = jax.random.split(key)

    # Small shapes consistent with the module: n samples, m features, k << m.
    n, m, k = 16, 32, 8
    x = jax.random.normal(kx, (n, m), dtype=jnp.float32)
    V = make_orthogonal(kv, m, k)   # same shape as the torch Parameter: (size, n_components)

    ref = (x @ V) @ V.T

    # f32 path, Gram form (default for small m).
    out = jax.block_until_ready(rec_layer(x, V))
    assert out.shape == (n, m)
    assert jnp.allclose(out, ref, atol=1e-4, rtol=1e-4)

    # Two-pass fallback path (used automatically when m >> k).
    out2 = jax.block_until_ready(rec_layer(x, V, use_gram=False))
    assert out2.shape == (n, m)
    assert jnp.allclose(out2, ref, atol=1e-4, rtol=1e-4)

    # bf16 streaming I/O (memory-bound win); looser tolerance for the bf16 round trip.
    out_bf = jax.block_until_ready(rec_layer(x.astype(jnp.bfloat16), V))
    assert out_bf.shape == (n, m) and out_bf.dtype == jnp.bfloat16
    assert jnp.allclose(out_bf.astype(jnp.float32), ref, atol=1e-1, rtol=5e-2)

    print("KERNEL_OK")
</pallas_src>

<mosaic_0001>
module attributes {stable_mosaic.version = 11 : i64} {
  func.func @_rec_gram_kernel(%arg0: i32, %arg1: memref<16x32xf32, #tpu.memory_space<vmem>>, %arg2: memref<32x128xf32, #tpu.memory_space<vmem>>, %arg3: memref<16x128xf32, #tpu.memory_space<vmem>>) attributes {dimension_semantics = [#tpu.dimension_semantics<parallel>], iteration_bounds = array<i64: 1>, scalar_prefetch = 0 : i64, scratch_operands = 0 : i64, tpu.core_type = #tpu.core_type<tc>, window_params = [{transform_indices = @transform_0, window_bounds = array<i64: 16, 32>}, {pipeline_mode = #tpu.pipeline_mode<synchronous>, transform_indices = @transform_1, window_bounds = array<i64: 32, 128>}, {transform_indices = @transform_2, window_bounds = array<i64: 16, 128>}]} {
    %c0 = arith.constant 0 : index
    %c0_0 = arith.constant 0 : index
    %0 = vector.load %arg1[%c0, %c0_0] : memref<16x32xf32, #tpu.memory_space<vmem>>, vector<16x32xf32>
    %c0_1 = arith.constant 0 : index
    %c0_2 = arith.constant 0 : index
    %1 = vector.load %arg2[%c0_1, %c0_2] : memref<32x128xf32, #tpu.memory_space<vmem>>, vector<32x128xf32>
    %cst = arith.constant dense<0.000000e+00> : vector<16x128xf32>
    %2 = tpu.matmul %0, %1, %cst {dimension_numbers = #tpu.dot_dimension_numbers<[1], [0], [0], [1], [0, 0, 1, 1], [], []>} : vector<16x32xf32>, vector<32x128xf32>, vector<16x128xf32> -> vector<16x128xf32>
    %c0_3 = arith.constant 0 : index
    %c0_4 = arith.constant 0 : index
    %3 = vector.load %arg3[%c0_3, %c0_4] : memref<16x128xf32, #tpu.memory_space<vmem>>, vector<16x128xf32>
    tpu.vector_store %arg3[%c0_3, %c0_4], %2 {strides = array<i32>} : memref<16x128xf32, #tpu.memory_space<vmem>>, vector<16x128xf32>,
    return
  }
  func.func @transform_0(%arg0: i32) -> (i32, i32) {
    %c0_i32 = arith.constant 0 : i32
    %c0_i32_0 = arith.constant 0 : i32
    return %arg0, %c0_i32 : i32, i32
  }
  func.func @transform_1(%arg0: i32) -> (i32, i32) {
    %c0_i32 = arith.constant 0 : i32
    %c0_i32_0 = arith.constant 0 : i32
    %c0_i32_1 = arith.constant 0 : i32
    return %c0_i32, %c0_i32_0 : i32, i32
  }
  func.func @transform_2(%arg0: i32) -> (i32, i32) {
    %c0_i32 = arith.constant 0 : i32
    %c0_i32_0 = arith.constant 0 : i32
    return %arg0, %c0_i32 : i32, i32
  }
}

</mosaic_0001>

<bundles_post_ra>
// kernel: tpu_custom_call.1
= control target key start
LH: loop header
LB: loop body
LE: loop exit
PB: predicated region body
PF: predicated region fallthrough
CT: control target
= control target key end

     0   :  { %7 = vsyncpa [#allocation3], 0  ;;  %s229_s0 = inlined_call_operand.hbm [shape: f32[16,32], index: 0, kind: input, shape index: {}]   ;;  %s230_s1 = inlined_call_operand.hbm [shape: f32[32,128], index: 1, kind: input, shape index: {}]   ;;  %s231_s2 = inlined_call_operand.hbm [shape: f32[16,128], index: 2, kind: output, shape index: {}]  }
   0x1   :  { %8 = vsyncpa [#allocation6], 0 }
   0x2   :  { %9 = vsyncpa [#allocation4], 0  ;;  %s14_s11 = sshll.u32 %s229_s0, 4  ;;  %s191_s12 = smov [#allocation2]   ;;  %s15_s11 = int_to_ptr.hbm [resolvable:$true] %s14_s11 }
   0x3   :  { %s16_s13 = sshll.u32 %s191_s12, 4  ;;  %s27_s16 = sshll.u32 %s230_s1, 4  ;;  %s17_s13 = int_to_ptr.vmem [resolvable:$true] %s16_s13  ;;  %s28_s16 = int_to_ptr.hbm [resolvable:$true] %s27_s16 }
   0x4   :  { %s192_s17 = smov 128   ;;  %s193_s18 = smov 8  }
   0x5   :  { %22 = dma.hbm_to_vmem [thread:$0]  %s15_s11, 256, %s17_s13, [#allocation3], %s192_s17, %s192_s17, %s193_s18  }
   0x6   :  { %s194_s19 = smov [#allocation5]  }
   0x7   :  { %s29_s20 = sshll.u32 %s194_s19, 4  ;;  %s30_s20 = int_to_ptr.vmem [resolvable:$true] %s29_s20 }
   0x8   :  { %35 = dma.hbm_to_vmem [thread:$0]  %s28_s16, 512, %s30_s20, [#allocation6], %s192_s17, %s192_s17, %s193_s18  }
   0x9   :  { %185 = dma.done.wait [#allocation3], 256  }
   0xa   :  { %186 = vsyncadd [#allocation3], 4294967040 }
   0xb   :  { %187 = dma.done.wait [#allocation6], 512  }
   0xc   :  { %188 = vsyncadd [#allocation6], 4294966784  ;;  %v49_v0 = vld [vmem:[#allocation5 + $0x18] sm:$0xff]  ;;  %v48_v1 = vld [vmem:[#allocation5 + $0x10] sm:$0xff]  ;;  %vm50_vm0 = vcmask 261120   ;;  %s195_s0 = smov [#allocation7]  }
   0xd   :  { %69 = vmatpush.msra.mxu0 %v49_v0  ;;  %104 = vmatpush.msra.mxu1 %v49_v0  ;;  %v47_v2 = vld [vmem:[#allocation5 + $0x8] sm:$0xff]  ;;  %v46_v3 = vld [vmem:[#allocation5] sm:$0xff]  ;;  %v44_v4 = vld [vmem:[#allocation2] sm:$0xff]  ;;  %s86_s1 = sshll.u32 %s195_s0, 4  ;;  %s88_s23 = sshll.u32 %s231_s2, 4  ;;  %s87_s1 = int_to_ptr.vmem [resolvable:$true] %s86_s1  ;;  %s89_s23 = int_to_ptr.hbm [resolvable:$true] %s88_s23 }
   0xe   :  { %v45_v5 = vld [vmem:[#allocation2 + $0x8] sm:$0xff] }
   0xf   :  { %70 = vmatpush.msra.mxu0 %v48_v1  ;;  %105 = vmatpush.msra.mxu1 %v48_v1 }
  0x11   :  { %71 = vmatpush.msra.mxu0 %v47_v2  ;;  %106 = vmatpush.msra.mxu1 %v47_v2 }
  0x13   :  { %72 = vmatpush.msra.mxu0 %v46_v3  ;;  %107 = vmatpush.msra.mxu1 %v46_v3 }
  0x14   :  { %102 = vmatmul.msk.f32.vlgmr.msra.gmra.mxu0 %vm50_vm0, %v44_v4  ;;  %103 = vmatmul.msk.f32.vlgmr.msra.gmra.mxu1 %vm50_vm0, %v45_v5 }
  0x91   :  { %v74_v6 = vpop.f32.mrf.mxu0  ;;  %v77_v7 = vpop.f32.mrf.mxu1 }
  0x92   :  { %80 = vst [vmem:[#allocation7] sm:$0xff] %v74_v6 }
  0x93   :  { %81 = vst [vmem:[#allocation7 + $0x8] sm:$0xff] %v77_v7 }
  0x94   :  { %94 = dma.vmem_to_hbm [thread:$0]  %s87_s1, 256, %s89_s23, [#allocation4], %s192_s17, %s192_s17, %s193_s18  }
  0x95   :  { %189 = dma.done.wait [#allocation4], 256  }
  0x96   :  { %190 = vsyncadd [#allocation4], 4294967040 }
  0x97   :  { %99 = vsyncpa [#allocation3], 1 }
  0x98   :  { %100 = vsyncpa [#allocation6], 1 }
  0x99   :  { %101 = vsyncpa [#allocation4], 1 }

</bundles_post_ra>
